<compile_context>
chip_gen: v6e
topology: v6e:2x2x1
jax: 0.10.0
libtpu: 0.0.40
codegen_flags: <defaults>
</compile_context>

<pallas_src>
import jax
import jax.numpy as jnp
from jax.experimental import pallas as pl
from jax.experimental.pallas import tpu as pltpu

C_IN = 224    # channels of x27 / x28 (fixed by the module's Conv2d defs)
C_MID = 56    # squeeze channels
TN_MAX = 2048  # max lanes of P per grid step (fits v5e/v6e/v7x VMEM budgets)


def _pick_tile_n(P, max_tile=TN_MAX):
    """Multiple-of-128 lane tile giving >= 2 roughly balanced grid steps."""
    p128 = pl.cdiv(P, 128) * 128
    n_steps = max(2, pl.cdiv(p128, max_tile))          # >= 2 steps: pipelining + v7x dual-TC
    tn = pl.cdiv(pl.cdiv(p128, n_steps), 128) * 128    # balanced, multiple of 128
    return max(tn, 128)


def se_conv1x1_kernel(s_ref, w1_ref, b1_ref, w2t_ref, b2_ref, w3_ref,
                      x_ref, o_ref):
    """One (C_out, tn) output tile of conv2d11 applied to the gated input.

    Gate math is done with f32 VPU multiply+reduce (not MXU) so it matches the
    reference tightly; it is tiny and hidden under the x-tile DMA.
    """
    # conv2d9 + ReLU: h[j] = relu(sum_c w1[j, c] * s[c] + b1[j])   -> (56, 1)
    h = jnp.maximum(
        jnp.sum(w1_ref[...] * s_ref[...], axis=1, keepdims=True) + b1_ref[...],
        0.0)
    # conv2d10 + Sigmoid: g[i] = sigmoid(sum_j w2t[j, i] * h[j] + b2[i]) -> (1, 224)
    g = jax.nn.sigmoid(
        jnp.sum(w2t_ref[...] * h, axis=0, keepdims=True) + b2_ref[...])
    # Fold gate into conv2d11's input-channel columns: w_scaled[o, c] = w3[o, c] * g[c]
    w_scaled = (w3_ref[...] * g).astype(x_ref.dtype)
    # conv2d11 as a channel matmul on the (C, P) view; f32 MXU accumulation.
    o_ref[...] = jnp.dot(
        w_scaled, x_ref[...], preferred_element_type=jnp.float32
    ).astype(o_ref.dtype)


def se_block(x27_nchw, x28_nchw, w1, b1, w2, b2, w3, *, out_dtype=jnp.float32):
    """Forward pass of module M.

    x27_nchw: (1, 224, H, W)   feature map
    x28_nchw: (1, 224, 1, 1)   squeezed vector
    w1: (56, 224)  b1: (56,)     -- conv2d9
    w2: (224, 56)  b2: (224,)    -- conv2d10
    w3: (224, 224)               -- conv2d11 (no bias)
    returns (1, 224, H, W) of `out_dtype`
    """
    N, C, H, W = x27_nchw.shape
    assert N == 1 and C == C_IN  # module spec uses batch=1; (C, P) view needs N=1
    P = H * W

    # Hot tensor: transpose-free (C, P) view, NO dtype cast (HBM-bound kernel).
    x_cp = x27_nchw.reshape(C_IN, P)

    # Tiny constant operands, reshaped once in the wrapper (a few KB total).
    s_row = x28_nchw.reshape(1, C_IN)     # (1, 224)
    b1_col = b1.reshape(C_MID, 1)         # (56, 1)
    w2t = jnp.transpose(w2)               # (56, 224)
    b2_row = b2.reshape(1, C_IN)          # (1, 224)

    tn = _pick_tile_n(P)
    grid_n = max(1, pl.cdiv(P, tn))       # ragged last block masked by Pallas

    full = lambda i: (0, 0)               # constant-index blocks: fetched once
    out_cp = pl.pallas_call(
        se_conv1x1_kernel,
        out_shape=jax.ShapeDtypeStruct((C_IN, P), out_dtype),
        grid_spec=pltpu.PrefetchScalarGridSpec(
            num_scalar_prefetch=0,
            grid=(grid_n,),
            in_specs=[
                pl.BlockSpec((1, C_IN), full),        # s   (x28 squeezed)
                pl.BlockSpec((C_MID, C_IN), full),    # w1
                pl.BlockSpec((C_MID, 1), full),       # b1 (column)
                pl.BlockSpec((C_MID, C_IN), full),    # w2^T
                pl.BlockSpec((1, C_IN), full),        # b2 (row)
                pl.BlockSpec((C_IN, C_IN), full),     # w3
                pl.BlockSpec((C_IN, tn), lambda i: (0, i)),   # x tile (lanes = P)
            ],
            out_specs=pl.BlockSpec((C_IN, tn), lambda i: (0, i)),
        ),
        compiler_params=pltpu.CompilerParams(
            dimension_semantics=("parallel",),        # v7x: steps shard across TCs
            vmem_limit_bytes=32 * 1024 * 1024,
        ),
    )(s_row, w1, b1_col, w2t, b2_row, w3, x_cp)

    return out_cp.reshape(N, C_IN, H, W)              # free reshape back


def reference(x27, x28, w1, b1, w2, b2, w3):
    # pure-JAX f32 reference of the PyTorch forward (1x1 convs == channel matmuls)
    s = x28.reshape(-1)                                    # (224,)
    h = jnp.maximum(w1 @ s + b1, 0.0)                      # (56,)  conv2d9 + ReLU
    g = jax.nn.sigmoid(w2 @ h + b2)                        # (224,) conv2d10 + Sigmoid
    x33 = x27 * g[None, :, None, None]                     # broadcast multiply
    return jnp.einsum("oc,nchw->nohw", w3, x33)            # conv2d11 (no bias)


if __name__ == "__main__":
    key = jax.random.PRNGKey(0)
    k = jax.random.split(key, 7)

    # deterministic synthetic parameters (scaled like default torch init)
    w1 = jax.random.normal(k[2], (C_MID, C_IN), jnp.float32) * (1.0 / C_IN) ** 0.5
    b1 = jax.random.normal(k[3], (C_MID,), jnp.float32) * 0.05
    w2 = jax.random.normal(k[4], (C_IN, C_MID), jnp.float32) * (1.0 / C_MID) ** 0.5
    b2 = jax.random.normal(k[5], (C_IN,), jnp.float32) * 0.05
    w3 = jax.random.normal(k[6], (C_IN, C_IN), jnp.float32) * (1.0 / C_IN) ** 0.5

    # Small shapes consistent with the module (channels fixed at 224/56):
    #   16x16 -> P=256  (lane-aligned, 2 grid steps)
    #   28x28 -> P=784  (ragged last block: exercises cdiv-grid masking)
    for (H, W) in [(16, 16), (28, 28)]:
        x27 = jax.random.normal(k[0], (1, C_IN, H, W), jnp.float32)
        x28 = jax.random.normal(k[1], (1, C_IN, 1, 1), jnp.float32)
        ref = reference(x27, x28, w1, b1, w2, b2, w3)

        out = jax.block_until_ready(se_block(x27, x28, w1, b1, w2, b2, w3))
        assert out.shape == (1, C_IN, H, W)
        assert jnp.allclose(out, ref, atol=1e-3, rtol=1e-3), f"f32 mismatch at H=W={H}"

    # optional bandwidth-saving bf16 output (f32 accumulation in-kernel)
    out_bf16 = jax.block_until_ready(
        se_block(x27, x28, w1, b1, w2, b2, w3, out_dtype=jnp.bfloat16))
    assert out_bf16.dtype == jnp.bfloat16
    assert jnp.allclose(out_bf16.astype(jnp.float32), ref, atol=5e-2, rtol=5e-2), \
        "bf16-output mismatch vs reference"

    print("KERNEL_OK")
</pallas_src>

<mosaic_0001>
module attributes {stable_mosaic.version = 11 : i64} {
  func.func @se_conv1x1_kernel(%arg0: i32, %arg1: memref<1x224xf32, #tpu.memory_space<vmem>>, %arg2: memref<56x224xf32, #tpu.memory_space<vmem>>, %arg3: memref<56x1xf32, #tpu.memory_space<vmem>>, %arg4: memref<56x224xf32, #tpu.memory_space<vmem>>, %arg5: memref<1x224xf32, #tpu.memory_space<vmem>>, %arg6: memref<224x224xf32, #tpu.memory_space<vmem>>, %arg7: memref<224x128xf32, #tpu.memory_space<vmem>>, %arg8: memref<224x128xf32, #tpu.memory_space<vmem>>) attributes {dimension_semantics = [#tpu.dimension_semantics<parallel>], iteration_bounds = array<i64: 2>, scalar_prefetch = 0 : i64, scratch_operands = 0 : i64, tpu.core_type = #tpu.core_type<tc>, window_params = [{pipeline_mode = #tpu.pipeline_mode<synchronous>, transform_indices = @transform_0, window_bounds = array<i64: 1, 224>}, {pipeline_mode = #tpu.pipeline_mode<synchronous>, transform_indices = @transform_1, window_bounds = array<i64: 56, 224>}, {pipeline_mode = #tpu.pipeline_mode<synchronous>, transform_indices = @transform_2, window_bounds = array<i64: 56, 1>}, {pipeline_mode = #tpu.pipeline_mode<synchronous>, transform_indices = @transform_3, window_bounds = array<i64: 56, 224>}, {pipeline_mode = #tpu.pipeline_mode<synchronous>, transform_indices = @transform_4, window_bounds = array<i64: 1, 224>}, {pipeline_mode = #tpu.pipeline_mode<synchronous>, transform_indices = @transform_5, window_bounds = array<i64: 224, 224>}, {transform_indices = @transform_6, window_bounds = array<i64: 224, 128>}, {transform_indices = @transform_7, window_bounds = array<i64: 224, 128>}]} {
    %c0 = arith.constant 0 : index
    %c0_0 = arith.constant 0 : index
    %0 = vector.load %arg2[%c0, %c0_0] : memref<56x224xf32, #tpu.memory_space<vmem>>, vector<56x224xf32>
    %c0_1 = arith.constant 0 : index
    %c0_2 = arith.constant 0 : index
    %1 = vector.load %arg1[%c0_1, %c0_2] : memref<1x224xf32, #tpu.memory_space<vmem>>, vector<1x224xf32>
    %2 = vector.broadcast %1 : vector<1x224xf32> to vector<56x224xf32>
    %3 = arith.mulf %0, %2 : vector<56x224xf32>
    %cst = arith.constant dense<0.000000e+00> : vector<56xf32>
    %4 = vector.multi_reduction <add>, %3, %cst [1] : vector<56x224xf32> to vector<56xf32>
    %5 = vector.shape_cast %4 : vector<56xf32> to vector<56x1xf32>
    %c0_3 = arith.constant 0 : index
    %c0_4 = arith.constant 0 : index
    %6 = vector.load %arg3[%c0_3, %c0_4] : memref<56x1xf32, #tpu.memory_space<vmem>>, vector<56x1xf32>
    %7 = arith.addf %5, %6 : vector<56x1xf32>
    %cst_5 = arith.constant 0.000000e+00 : f32
    %8 = vector.broadcast %cst_5 : f32 to vector<56x1xf32>
    %9 = arith.maximumf %7, %8 : vector<56x1xf32>
    %c0_6 = arith.constant 0 : index
    %c0_7 = arith.constant 0 : index
    %10 = vector.load %arg4[%c0_6, %c0_7] : memref<56x224xf32, #tpu.memory_space<vmem>>, vector<56x224xf32>
    %11 = vector.broadcast %9 : vector<56x1xf32> to vector<56x224xf32>
    %12 = arith.mulf %10, %11 : vector<56x224xf32>
    %cst_8 = arith.constant dense<0.000000e+00> : vector<224xf32>
    %13 = vector.multi_reduction <add>, %12, %cst_8 [0] : vector<56x224xf32> to vector<224xf32>
    %14 = vector.shape_cast %13 : vector<224xf32> to vector<1x224xf32>
    %c0_9 = arith.constant 0 : index
    %c0_10 = arith.constant 0 : index
    %15 = vector.load %arg5[%c0_9, %c0_10] : memref<1x224xf32, #tpu.memory_space<vmem>>, vector<1x224xf32>
    %16 = arith.addf %14, %15 : vector<1x224xf32>
    %17 = arith.negf %16 : vector<1x224xf32>
    %18 = math.exp %17 : vector<1x224xf32>
    %cst_11 = arith.constant 1.000000e+00 : f32
    %19 = vector.broadcast %cst_11 : f32 to vector<1x224xf32>
    %20 = arith.addf %19, %18 : vector<1x224xf32>
    %21 = arith.divf %19, %20 : vector<1x224xf32>
    %c0_12 = arith.constant 0 : index
    %c0_13 = arith.constant 0 : index
    %22 = vector.load %arg6[%c0_12, %c0_13] : memref<224x224xf32, #tpu.memory_space<vmem>>, vector<224x224xf32>
    %23 = vector.broadcast %21 : vector<1x224xf32> to vector<224x224xf32>
    %24 = arith.mulf %22, %23 : vector<224x224xf32>
    %c0_14 = arith.constant 0 : index
    %c0_15 = arith.constant 0 : index
    %25 = vector.load %arg7[%c0_14, %c0_15] : memref<224x128xf32, #tpu.memory_space<vmem>>, vector<224x128xf32>
    %cst_16 = arith.constant dense<0.000000e+00> : vector<224x128xf32>
    %26 = tpu.matmul %24, %25, %cst_16 {dimension_numbers = #tpu.dot_dimension_numbers<[1], [0], [0], [1], [0, 0, 1, 1], [], []>} : vector<224x224xf32>, vector<224x128xf32>, vector<224x128xf32> -> vector<224x128xf32>
    %c0_17 = arith.constant 0 : index
    %c0_18 = arith.constant 0 : index
    %27 = vector.load %arg8[%c0_17, %c0_18] : memref<224x128xf32, #tpu.memory_space<vmem>>, vector<224x128xf32>
    tpu.vector_store %arg8[%c0_17, %c0_18], %26 {strides = array<i32>} : memref<224x128xf32, #tpu.memory_space<vmem>>, vector<224x128xf32>,
    return
  }
  func.func @transform_0(%arg0: i32) -> (i32, i32) {
    %c0_i32 = arith.constant 0 : i32
    %c0_i32_0 = arith.constant 0 : i32
    %c0_i32_1 = arith.constant 0 : i32
    return %c0_i32, %c0_i32_0 : i32, i32
  }
  func.func @transform_1(%arg0: i32) -> (i32, i32) {
    %c0_i32 = arith.constant 0 : i32
    %c0_i32_0 = arith.constant 0 : i32
    %c0_i32_1 = arith.constant 0 : i32
    return %c0_i32, %c0_i32_0 : i32, i32
  }
  func.func @transform_2(%arg0: i32) -> (i32, i32) {
    %c0_i32 = arith.constant 0 : i32
    %c0_i32_0 = arith.constant 0 : i32
    %c0_i32_1 = arith.constant 0 : i32
    return %c0_i32, %c0_i32_0 : i32, i32
  }
  func.func @transform_3(%arg0: i32) -> (i32, i32) {
    %c0_i32 = arith.constant 0 : i32
    %c0_i32_0 = arith.constant 0 : i32
    %c0_i32_1 = arith.constant 0 : i32
    return %c0_i32, %c0_i32_0 : i32, i32
  }
  func.func @transform_4(%arg0: i32) -> (i32, i32) {
    %c0_i32 = arith.constant 0 : i32
    %c0_i32_0 = arith.constant 0 : i32
    %c0_i32_1 = arith.constant 0 : i32
    return %c0_i32, %c0_i32_0 : i32, i32
  }
  func.func @transform_5(%arg0: i32) -> (i32, i32) {
    %c0_i32 = arith.constant 0 : i32
    %c0_i32_0 = arith.constant 0 : i32
    %c0_i32_1 = arith.constant 0 : i32
    return %c0_i32, %c0_i32_0 : i32, i32
  }
  func.func @transform_6(%arg0: i32) -> (i32, i32) {
    %c0_i32 = arith.constant 0 : i32
    %c0_i32_0 = arith.constant 0 : i32
    return %c0_i32, %arg0 : i32, i32
  }
  func.func @transform_7(%arg0: i32) -> (i32, i32) {
    %c0_i32 = arith.constant 0 : i32
    %c0_i32_0 = arith.constant 0 : i32
    return %c0_i32, %arg0 : i32, i32
  }
}

</mosaic_0001>

<bundles_post_ra>
// kernel: tpu_custom_call.1
= control target key start
LH: loop header
LB: loop body
LE: loop exit
PB: predicated region body
PF: predicated region fallthrough
CT: control target
= control target key end

     0   :  { %s2044_s0 = inlined_call_operand.vmem [shape: f32[1,224], index: 0, kind: input, shape index: {}]   ;;  %s2045_s1 = inlined_call_operand.hbm [shape: f32[56,224], index: 1, kind: input, shape index: {}]   ;;  %s2046_s2 = inlined_call_operand.vmem [shape: f32[56,1], index: 2, kind: input, shape index: {}]   ;;  %s2047_s3 = inlined_call_operand.hbm [shape: f32[56,224], index: 3, kind: input, shape index: {}]   ;;  %s2048_s4 = inlined_call_operand.vmem [shape: f32[1,224], index: 4, kind: input, shape index: {}]   ;;  %s2049_s5 = inlined_call_operand.hbm [shape: f32[224,224], index: 5, kind: input, shape index: {}]   ;;  %s2050_s6 = inlined_call_operand.hbm [shape: f32[224,256], index: 6, kind: input, shape index: {}]   ;;  %s2051_s7 = inlined_call_operand.hbm [shape: f32[224,256], index: 7, kind: output, shape index: {}]  }
   0x1   :  { %2056 = sst [smem:[#allocation16_spill]] %s2045_s1 }
   0x2   :  { %2057 = sst [smem:[#allocation17_spill]] %s2047_s3 }
   0x3   :  { %12 = vsyncpa [#allocation3], 0 }
   0x4   :  { %13 = vsyncpa [#allocation6], 0 }
   0x5   :  { %14 = vsyncpa [#allocation9], 0 }
   0x6   :  { %16 = vsyncpa [#allocation9 + $0x1], 0 }
   0x7   :  { %17 = vsyncpa [#allocation4], 0 }
   0x8   :  { %19 = vsyncpa [#allocation4 + $0x1], 0  ;;  %s1564_s24 = smov 0   ;;  %s1566_s25 = smov 0  }
   0x9   :  { %s1568_s26 = smov 0   ;;  %s1570_s27 = smov 0  }
   0xa LB: > { %s1585_s28 = sadd.s32 4294967295, %s1508_s27   ;;  %s1132_s29 = sadd.s32 4294967294, %s1508_s27   ;;  %s1508_s27 = sphi %s1570_s27, %s2081_s27   ;;  %s1504_s26 = sphi %s1568_s26, %s2080_s26   ;;  %s1500_s25 = sphi %s1566_s25, %s2079_s25   ;;  %s1496_s24 = sphi %s1564_s24, %s2078_s24  }
   0xb   : > { %s1589_s30 = sadd.s32 1, %s1508_s27   ;;  %s158_s8 = sadd.s32 1, %s1504_s26 }
   0xc   : > { %s155_s9 = ssub.s32 %s1508_s27, %s1589_s30  ;;  %p165_p0 = scmp.ne.s32.totalorder %s1504_s26, %s1500_s25 }
   0xd   : > { %p156_p1 = scmp.eq.s32.totalorder %s155_s9, 0  ;;  %p166_p2 = scmp.eq.s32.totalorder %s1508_s27, 0 }
   0xe   : > { %p171_p3 = scmp.ne.s32.totalorder %s1500_s25, %s1496_s24  ;;  %p2053_p4 = scmp.eq.s32.totalorder %s1585_s28, 0 }
   0xf   : > { %s1601_s10 = scalar_select %p156_p1, %s1504_s26, %s158_s8  }
  0x10   : > { %p1603_p5 = por %p166_p2, %p165_p0  ;;  %p1609_p6 = por %p2053_p4, %p171_p3 }
  0x11   : > { %2058 = sst [smem:[#allocation15_spill]] %s1601_s10  ;;  %p195_p7 = scmp.eq.s32.totalorder %s1585_s28, 1 }
  0x12   : > { %s2060_s12 = scalar_select %p1609_p6, 1, 0 }
  0x13   : > { %p201_p8 = scmp.eq.s32.totalorder %s1132_s29, 1  ;;  %p1133_p9 = scmp.ge.s32.totalorder %s1508_s27, 1 }
  0x14   : > { %p208_p10 = scmp.lt.s32.totalorder %s1508_s27, 3  ;;  %p1616_p11 = por %p195_p7, %p165_p0 }
  0x15   : > { %p1620_p12 = por %p201_p8, %p171_p3  ;;  %s1510_s16 = smov [#allocation5]  }
  0x16   : > { %s2061_s13 = scalar_select %p1616_p11, 1, 0 }
  0x17   : > { %s2062_s14 = scalar_select %p1620_p12, 1, 0 }
  0x18   : > { %p1624_p13 = pnand %p1133_p9, %p208_p10  ;;  %s239_s17 = sshll.u32 %s1510_s16, 4  ;;  %s240_s17 = int_to_ptr.vmem [resolvable:$true] %s239_s17 }
  0x19   : > { %p1271_p0 = scmp.lt.s32.totalorder %s1508_s27, 2  ;;  %s1511_s19 = smov [#allocation2]  }
  0x1a   : > { %s2063_s15 = scalar_select %p1624_p13, 1, 0 }
  0x1b   : > { %p1250_p1 = pneg %p1624_p13  ;;  %s223_s20 = sshll.u32 %s1511_s19, 4  ;;  %s224_s20 = int_to_ptr.vmem [resolvable:$true] %s223_s20 }
  0x1c   : > { %s1341_s21 = scalar_lea.vmem %s240_s17, 1792  ;;  %p1349_p10 = scmp.lt.s32.totalorder %s240_s17, %s240_s17 }
  0x1d   : > { %p1633_p6 = pnand %p1250_p1, %p2053_p4  ;;  %p1342_p7 = scmp.ne.s32.totalorder %s240_s17, %s1341_s21 }
  0x1e   : > { %p1350_p2 = scmp.lt.s32.totalorder %s1341_s21, %s1341_s21 }
  0x1f   : > { %p1332_p3 = pneg %p1633_p6 }
  0x20   : > { %p1351_p1 = por %p1350_p2, %p1349_p10 }
  0x21   : > { %p1344_p8 = pnand %p1342_p7, %p1332_p3 }
  0x23   : > { %p1345_p9 = pneg %p1344_p8 }
  0x25   : > { %p1352_p4 = pnand %p1351_p1, %p1345_p9 }
  0x27   : > { %1355 = shalt.err (!%p1352_p4)
}
  0x28   : > { %s1512_s22 = smov 256   ;;  %s1513_s23 = smov 16  }
  0x29   : > { %s2065_s3 = sld [smem:[#allocation17_spill]]  ;;  %p1655_p7 = pnand %p1271_p0, %p1603_p5 }
  0x2a   : > { %s1367_s16 = scalar_lea.vmem %s224_s20, 1792  ;;  %p1375_p9 = scmp.lt.s32.totalorder %s224_s20, %s224_s20 }
  0x2b   : > { %p1368_p4 = scmp.ne.s32.totalorder %s224_s20, %s1367_s16  ;;  %p1376_p10 = scmp.lt.s32.totalorder %s1367_s16, %s1367_s16 }
  0x2d   : > { %p1370_p2 = pnand %p1368_p4, %p1332_p3  ;;  %p1377_p1 = por %p1376_p10, %p1375_p9 }
  0x2f   : > { %1256 = dma.hbm_to_vmem [thread:$0]  (!%p1633_p6), %s2065_s3, 1792, %s240_s17, [#allocation6], %s1512_s22, %s1512_s22, %s1513_s23  }
  0x30   : > { %p1371_p8 = pneg %p1370_p2 }
  0x32   : > { %p1378_p12 = pnand %p1377_p1, %p1371_p8 }
  0x34   : > { %1381 = shalt.err (!%p1378_p12)
}
  0x35   : > { %s2067_s1 = sld [smem:[#allocation16_spill]]  ;;  %s1514_s19 = smov [#allocation7]  }
  0x36   : > { %s255_s21 = sshll.u32 %s1514_s19, 4  ;;  %s269_s29 = sand.u32 1, %s1504_s26   ;;  %s256_s21 = int_to_ptr.vmem [resolvable:$true] %s255_s21 }
  0x37   : > { %s1393_s8 = scalar_lea.vmem %s256_s21, 7168  ;;  %p1401_p4 = scmp.lt.s32.totalorder %s256_s21, %s256_s21 }
  0x38   : > { %p1394_p5 = scmp.ne.s32.totalorder %s256_s21, %s1393_s8  ;;  %p1402_p2 = scmp.lt.s32.totalorder %s1393_s8, %s1393_s8 }
  0x3a   : > { %p1396_p12 = pnand %p1394_p5, %p1332_p3  ;;  %p1403_p8 = por %p1402_p2, %p1401_p4 }
  0x3b   : > { %1253 = dma.hbm_to_vmem [thread:$0]  (!%p1633_p6), %s2067_s1, 1792, %s224_s20, [#allocation3], %s1512_s22, %s1512_s22, %s1513_s23  }
  0x3c   : > { %p1397_p0 = pneg %p1396_p12 }
  0x3e   : > { %p1404_p9 = pnand %p1403_p8, %p1397_p0 }
  0x40   : > { %1407 = shalt.err (!%p1404_p9)
}
  0x41   : > { %1259 = dma.hbm_to_vmem [thread:$0]  (!%p1633_p6), %s2049_s5, 7168, %s256_s21, [#allocation6], %s1512_s22, %s1512_s22, %s1513_s23  }
  0x42   : > { %s1232_s11 = smul.u32 224, %s269_s29  ;;  %s1138_s17 = sshll.u32 %s1508_s27, 7 }
  0x43   : > { %s1686_s8 = scalar_lea.hbm %s2050_s6, %s1138_s17  ;;  %s1690_s10 = scalar_lea.sflag [#allocation9], %s269_s29 }
  0x44   : > { %s273_s18 = scalar_lea.vmem [#allocation8], %s1232_s11  ;;  %s1408_s20 = scalar_lea.hbm %s1686_s8, 3584 }
  0x45   : > { %s279_s3 = sshll.u32 %s273_s18, 4  ;;  %p1409_p3 = scmp.ne.s32.totalorder %s1686_s8, %s1408_s20  ;;  %s1688_s3 = int_to_ptr.vmem [resolvable:$true] %s279_s3 }
  0x46   : > { %p1410_p6 = pneg %p1655_p7  ;;  %s1413_s1 = scalar_lea.hbm %s2050_s6, 7168 }
  0x47   : > { %p1414_p5 = scmp.lt.s32.totalorder %s1686_s8, %s2050_s6  ;;  %p1415_p12 = scmp.lt.s32.totalorder %s1413_s1, %s1408_s20 }
  0x48   : > { %p1411_p10 = pnand %p1410_p6, %p1409_p3 }
  0x49   : > { %p1416_p0 = por %p1415_p12, %p1414_p5 }
  0x4a   : > { %p1412_p1 = pneg %p1411_p10 }
  0x4c   : > { %p1417_p4 = pnand %p1416_p0, %p1412_p1 }
  0x4e   : > { %1420 = shalt.err (!%p1417_p4)
}
  0x4f   : > { %s1421_s29 = scalar_lea.vmem %s1688_s3, 3584  ;;  %s1515_s11 = smov [#allocation8]  }
  0x50   : > { %p1422_p2 = scmp.ne.s32.totalorder %s1688_s3, %s1421_s29  ;;  %s1426_s19 = sshll.u32 %s1515_s11, 4  ;;  %s1427_s19 = int_to_ptr.vmem [resolvable:$false] %s1426_s19 }
  0x51   : > { %s1428_s18 = scalar_lea.vmem %s1427_s19, 7168  ;;  %p1429_p3 = scmp.lt.s32.totalorder %s1688_s3, %s1427_s19 }
  0x52   : > { %p1424_p8 = pnand %p1422_p2, %p1410_p6  ;;  %p1430_p10 = scmp.lt.s32.totalorder %s1428_s18, %s1421_s29 }
  0x54   : > { %p1425_p9 = pneg %p1424_p8  ;;  %p1431_p11 = por %p1430_p10, %p1429_p3 }
  0x56   : > { %p1432_p13 = pnand %p1431_p11, %p1425_p9 }
  0x58   : > { %1435 = shalt.err (!%p1432_p13)
}
  0x59   : > { %s1516_s20 = smov 128   ;;  %s1517_s23 = smov 8  }
  0x5a   : > { %1263 = dma.hbm_to_vmem [thread:$0]  (!%p1655_p7), %s1686_s8, 3584, %s1688_s3, %s1690_s10, %s1512_s22, %s1516_s20, %s1517_s23  }
  0x5b   : > { %p2068_p6 = scmp.ne.s32.totalorder %s2063_s15, 0 }
  0x5c   : > { %p2069_p1 = scmp.eq.s32.totalorder (!%p2068_p6), %s1585_s28, 0 }
  0x5d   : > { %291 = sbr.rel (%p2068_p6) target bundleno = 723 (0x2d3), region = 48 }
  0x62   : > { %1479 = dma.done.wait (%p2069_p1), [#allocation3], 1792   ;;  %p2070_p5 = pmov %p2069_p1 }
  0x63   : > { %p2071_p11 = pmov %p2069_p1 }
  0x64   : > { %1481 = vsyncadd (%p2070_p5), [#allocation3], 4294965504 }
  0x65   : > { %1483 = dma.done.wait (%p2071_p11), [#allocation6], 8960   ;;  %p2072_p13 = pmov %p2069_p1 }
  0x66   : > { %s1723_s9 = sand.u32 1, %s1500_s25   ;;  %p2073_p7 = scmp.ne.s32.totalorder %s2060_s12, 0 }
  0x67   : > { %1485 = vsyncadd (%p2072_p13), [#allocation6], 4294958336  ;;  %s1233_s3 = smul.u32 224, %s1723_s9  ;;  %s306_s10 = scalar_lea.sflag [#allocation9], %s1723_s9 }
  0x69   : > { %s1729_s15 = scalar_lea.vmem [#allocation8], %s1233_s3 }
  0x6a   : > { %1487 = dma.done.wait (%p2073_p7), %s306_s10, 3584  }
  0x6b   : > { %1489 = vsyncadd (%p2073_p7), %s306_s10, 4294963712  ;;  %v356_v0 = vlaneseq  ;;  %v340_v4 = vld [vmem:[#allocation2] sm:$0xff]  ;;  %v341_v5 = vld [vmem:[#allocation2 + $0x8] sm:$0xff]  ;;  %vm380_vm0 = vcmask 785408   ;;  %v1518_v49 = vmov 0   ;;  %s1964_s21 = scalar_lea.vmem [#allocation10], %s1233_s3 }
  0x6c   : > { %v354_v6 = vld [vmem:[%s2044_s0] sm:$0x3]  ;;  %v345_v10 = vld [vmem:[#allocation2 + $0x28] sm:$0xff]  ;;  %v342_v11 = vld [vmem:[#allocation2 + $0x10] sm:$0xff]  ;;  %1320 = vset.pattern.permute.xlu1 %v1518_v49  ;;  %1321 = vset.pattern.permute.xlu0 %v1518_v49  ;;  %s1173_s3 = sshll.u32 %s1585_s28, 7  ;;  %s1028_s1 = sshll.u32 %s1964_s21, 4  ;;  %s1999_s1 = int_to_ptr.vmem [resolvable:$true] %s1028_s1 }
  0x6d   : > { %v1735_v1 = vshrl.u32 %v356_v0, 7  ;;  %v344_v9 = vld [vmem:[#allocation2 + $0x20] sm:$0xff]  ;;  %v343_v12 = vld [vmem:[#allocation2 + $0x18] sm:$0xff]  ;;  %v346_v13 = vld [vmem:[#allocation2 + $0x30] sm:$0xff]  ;;  %s1997_s29 = scalar_lea.hbm %s2051_s7, %s1173_s3  ;;  %s1016_s28 = scalar_lea.sflag [#allocation4], %s1723_s9 }
  0x6e   : > { %v347_v14 = vld [vmem:[#allocation2 + $0x38] sm:$0xff]  ;;  %v349_v19 = vld [vmem:[#allocation2 + $0x48] sm:$0xff]  ;;  %v348_v24 = vld [vmem:[#allocation2 + $0x40] sm:$0xff]  ;;  %s1436_s11 = scalar_lea.vmem %s1999_s1, 3584  ;;  %p2074_p0 = scmp.ne.s32.totalorder %s2061_s13, 0 }
  0x6f   : > { %v1738_v2 = vsub.s32 0, %v1735_v1  ;;  %v362_v3 = vsub.s32 1, %v1735_v1  ;;  %v350_v28 = vld [vmem:[#allocation2 + $0x50] sm:$0xff]  ;;  %v351_v29 = vld [vmem:[#allocation2 + $0x58] sm:$0xff]  ;;  %v353_v34 = vld [vmem:[#allocation2 + $0x68] sm:$0xff]  ;;  %p1437_p12 = scmp.ne.s32.totalorder %s1999_s1, %s1436_s11  ;;  %s1520_s19 = smov [#allocation10]  }
  0x70   : > { %v352_v41 = vld [vmem:[#allocation2 + $0x60] sm:$0xff]  ;;  %v411_v51 = vld [vmem:[%s2046_s2 + $0x10] sm:$0xff]  ;;  %v410_v56 = vld [vmem:[%s2046_s2 + $0x8] sm:$0xff]  ;;  %s1440_s18 = sshll.u32 %s1520_s19, 4  ;;  %s1441_s18 = int_to_ptr.vmem [resolvable:$false] %s1440_s18 }
  0x71   : > { %v359_v7 = vrot.slane %v354_v6, %v1738_v2  ;;  %v363_v8 = vrot.slane %v354_v6, %v362_v3  ;;  %v409_v50 = vld [vmem:[%s2046_s2] sm:$0xff]  ;;  %v412_v57 = vld [vmem:[%s2046_s2 + $0x18] sm:$0xff]  ;;  %v433_v49 = vld [vmem:[#allocation5 + $0x18] sm:$0xff]  ;;  %p1438_p4 = pnand %p1437_p12, %p2074_p0  ;;  %s1442_s20 = scalar_lea.vmem %s1441_s18, 7168 }
  0x72   : > { %v413_v0 = vld [vmem:[%s2046_s2 + $0x20] sm:$0xff]  ;;  %p1443_p8 = scmp.lt.s32.totalorder %s1999_s1, %s1441_s18  ;;  %p1444_p9 = scmp.lt.s32.totalorder %s1442_s20, %s1436_s11 }
  0x73   : > { %v366_v15 = vmul.f32 %v359_v7, %v340_v4  ;;  %v367_v16 = vmul.f32 %v363_v8, %v341_v5  ;;  %v370_v17 = vmul.f32 %v359_v7, %v344_v9  ;;  %v371_v18 = vmul.f32 %v363_v8, %v345_v10  ;;  %p1439_p2 = pneg %p1438_p4 }
  0x74   : > { %v368_v20 = vmul.f32 %v359_v7, %v342_v11  ;;  %v369_v21 = vmul.f32 %v363_v8, %v343_v12  ;;  %v372_v22 = vmul.f32 %v359_v7, %v346_v13  ;;  %v373_v23 = vmul.f32 %v363_v8, %v347_v14  ;;  %v415_v12 = vld [vmem:[%s2046_s2 + $0x30] sm:$0xff]  ;;  %p1445_p3 = por %p1444_p9, %p1443_p8 }
  0x75   : > { %v381_v25 = vsel %vm380_vm0, %v367_v16, 0.0  ;;  %v389_v26 = vsel %vm380_vm0, %v371_v18, 0.0  ;;  %v375_v27 = vmul.f32 %v363_v8, %v349_v19  ;;  %v374_v36 = vmul.f32 %v359_v7, %v348_v24  ;;  %v685_v18 = vld [vmem:[%s1729_s15 + $0x78] sm:$0xff]  ;;  %v684_v19 = vld [vmem:[%s1729_s15 + $0x70] sm:$0xff]  ;;  %v679_v24 = vld [vmem:[%s1729_s15 + $0x48] sm:$0xff] }
  0x76   : > { %v382_v30 = vadd.f32 %v381_v25, %v366_v15  ;;  %v390_v31 = vadd.f32 %v389_v26, %v370_v17  ;;  %v385_v32 = vsel %vm380_vm0, %v369_v21, 0.0  ;;  %v393_v33 = vsel %vm380_vm0, %v373_v23, 0.0  ;;  %v682_v21 = vld [vmem:[%s1729_s15 + $0x60] sm:$0xff]  ;;  %v680_v23 = vld [vmem:[%s1729_s15 + $0x50] sm:$0xff]  ;;  %v677_v26 = vld [vmem:[%s1729_s15 + $0x38] sm:$0xff]  ;;  %p1446_p10 = pnand %p1445_p3, %p1439_p2 }
  0x77   : > { %v386_v35 = vadd.f32 %v385_v32, %v368_v20  ;;  %v394_v37 = vadd.f32 %v393_v33, %v372_v22  ;;  %v376_v38 = vmul.f32 %v359_v7, %v350_v28  ;;  %v377_v39 = vmul.f32 %v363_v8, %v351_v29  ;;  %v683_v20 = vld [vmem:[%s1729_s15 + $0x68] sm:$0xff]  ;;  %v681_v22 = vld [vmem:[%s1729_s15 + $0x58] sm:$0xff]  ;;  %v678_v25 = vld [vmem:[%s1729_s15 + $0x40] sm:$0xff] }
  0x78   : > { %383 = vadd.xlane.f32.xlu0 %v382_v30  ;;  %391 = vadd.xlane.f32.xlu1 %v390_v31  ;;  %v397_v40 = vsel %vm380_vm0, %v375_v27, 0.0  ;;  %v379_v42 = vmul.f32 %v363_v8, %v353_v34  ;;  %v378_v46 = vmul.f32 %v359_v7, %v352_v41  ;;  %v414_v8 = vld [vmem:[%s2046_s2 + $0x28] sm:$0xff]  ;;  %v1519_v17 = vmov 0.0   ;;  %v676_v27 = vld [vmem:[%s1729_s15 + $0x30] sm:$0xff]  ;;  %v674_v29 = vld [vmem:[%s1729_s15 + $0x20] sm:$0xff] }
  0x79   : > { %v401_v43 = vsel %vm380_vm0, %v377_v39, 0.0  ;;  %v398_v44 = vadd.f32 %v397_v40, %v374_v36  ;;  %782 = vmatprep.subr.mxu0 %v1519_v17  ;;  %1176 = vmatprep.subr.mxu1 %v1519_v17  ;;  %v675_v28 = vld [vmem:[%s1729_s15 + $0x28] sm:$0xff]  ;;  %v673_v30 = vld [vmem:[%s1729_s15 + $0x18] sm:$0xff]  ;;  %v672_v31 = vld [vmem:[%s1729_s15 + $0x10] sm:$0xff] }
  0x7a   : > { %v402_v45 = vadd.f32 %v401_v43, %v376_v38  ;;  %v405_v47 = vsel %vm380_vm0, %v379_v42, 0.0  ;;  %783 = vmatpush1.msra.mxu0 %v685_v18  ;;  %1204 = vmatpush1.msra.mxu1 %v685_v18  ;;  %v671_v32 = vld [vmem:[%s1729_s15 + $0x8] sm:$0xff]  ;;  %v670_v33 = vld [vmem:[%s1729_s15] sm:$0xff]  ;;  %v697_v34 = vld [vmem:[%s1729_s15 + $0xd8] sm:$0xff] }
  0x7b   : > { %v406_v48 = vadd.f32 %v405_v47, %v378_v46  ;;  %784 = vmatprep.subr.mxu0 %v1519_v17  ;;  %1177 = vmatprep.subr.mxu1 %v1519_v17  ;;  %v695_v36 = vld [vmem:[%s1729_s15 + $0xc8] sm:$0xff]  ;;  %v693_v38 = vld [vmem:[%s1729_s15 + $0xb8] sm:$0xff]  ;;  %v692_v39 = vld [vmem:[%s1729_s15 + $0xb0] sm:$0xff] }
  0x7c   : > { %387 = vadd.xlane.f32.xlu0 %v386_v35  ;;  %395 = vadd.xlane.f32.xlu1 %v394_v37  ;;  %v696_v35 = vld [vmem:[%s1729_s15 + $0xd0] sm:$0xff]  ;;  %v694_v37 = vld [vmem:[%s1729_s15 + $0xc0] sm:$0xff]  ;;  %v691_v40 = vld [vmem:[%s1729_s15 + $0xa8] sm:$0xff] }
  0x7d   : > { %785 = vmatpush1.msra.mxu0 %v684_v19  ;;  %1205 = vmatpush1.msra.mxu1 %v684_v19  ;;  %v690_v41 = vld [vmem:[%s1729_s15 + $0xa0] sm:$0xff]  ;;  %v689_v42 = vld [vmem:[%s1729_s15 + $0x98] sm:$0xff]  ;;  %v688_v43 = vld [vmem:[%s1729_s15 + $0x90] sm:$0xff] }
  0x7e   : > { %786 = vmatprep.subr.mxu0 %v1519_v17  ;;  %1178 = vmatprep.subr.mxu1 %v1519_v17  ;;  %v431_v47 = vld [vmem:[#allocation5 + $0x8] sm:$0xff] }
  0x7f   : > { %787 = vmatpush1.msra.mxu0 %v683_v20  ;;  %1206 = vmatpush1.msra.mxu1 %v683_v20 }
  0x80   : > { %399 = vadd.xlane.f32.xlu0 %v398_v44  ;;  %403 = vadd.xlane.f32.xlu1 %v402_v45  ;;  %v687_v44 = vld [vmem:[%s1729_s15 + $0x88] sm:$0xff]  ;;  %v686_v45 = vld [vmem:[%s1729_s15 + $0x80] sm:$0xff] }
  0x81   : > { %788 = vmatprep.subr.mxu0 %v1519_v17  ;;  %1179 = vmatprep.subr.mxu1 %v1519_v17 }
  0x82   : > { %789 = vmatpush1.msra.mxu0 %v682_v21  ;;  %1207 = vmatpush1.msra.mxu1 %v682_v21 }
  0x83   : > { %790 = vmatprep.subr.mxu0 %v1519_v17  ;;  %1180 = vmatprep.subr.mxu1 %v1519_v17 }
  0x84   : > { %407 = vadd.xlane.f32.xlu0 %v406_v48  ;;  %791 = vmatpush1.msra.mxu0 %v681_v22  ;;  %v432_v48 = vld [vmem:[#allocation5 + $0x10] sm:$0xff] }
  0x85   : > { %1208 = vmatpush1.msra.mxu1 %v681_v22  ;;  %792 = vmatprep.subr.mxu0 %v1519_v17 }
  0x86   : > { %1181 = vmatprep.subr.mxu1 %v1519_v17  ;;  %793 = vmatpush1.msra.mxu0 %v680_v23 }
  0x87   : > { %1209 = vmatpush1.msra.mxu1 %v680_v23  ;;  %794 = vmatprep.subr.mxu0 %v1519_v17 }
  0x88   : > { %1182 = vmatprep.subr.mxu1 %v1519_v17  ;;  %795 = vmatpush1.msra.mxu0 %v679_v24 }
  0x89   : > { %1210 = vmatpush1.msra.mxu1 %v679_v24  ;;  %796 = vmatprep.subr.mxu0 %v1519_v17 }
  0x8a   : > { %1183 = vmatprep.subr.mxu1 %v1519_v17  ;;  %797 = vmatpush1.msra.mxu0 %v678_v25 }
  0x8b   : > { %1211 = vmatpush1.msra.mxu1 %v678_v25  ;;  %798 = vmatprep.subr.mxu0 %v1519_v17 }
  0x8c   : > { %1184 = vmatprep.subr.mxu1 %v1519_v17  ;;  %799 = vmatpush1.msra.mxu0 %v677_v26 }
  0x8d   : > { %1212 = vmatpush1.msra.mxu1 %v677_v26  ;;  %800 = vmatprep.subr.mxu0 %v1519_v17  ;;  %v442_v26 = vld [vmem:[#allocation5 + $0x60] sm:$0xff] }
  0x8e   : > { %1185 = vmatprep.subr.mxu1 %v1519_v17  ;;  %801 = vmatpush1.msra.mxu0 %v676_v27 }
  0x8f   : > { %1213 = vmatpush1.msra.mxu1 %v676_v27  ;;  %802 = vmatprep.subr.mxu0 %v1519_v17  ;;  %v443_v27 = vld [vmem:[#allocation5 + $0x68] sm:$0xff] }
  0x90   : > { %1186 = vmatprep.subr.mxu1 %v1519_v17  ;;  %803 = vmatpush1.msra.mxu0 %v675_v28 }
  0x91   : > { %1214 = vmatpush1.msra.mxu1 %v675_v28  ;;  %804 = vmatprep.subr.mxu0 %v1519_v17 }
  0x92   : > { %1187 = vmatprep.subr.mxu1 %v1519_v17  ;;  %805 = vmatpush1.msra.mxu0 %v674_v29 }
  0x93   : > { %1215 = vmatpush1.msra.mxu1 %v674_v29  ;;  %806 = vmatprep.subr.mxu0 %v1519_v17 }
  0x94   : > { %1188 = vmatprep.subr.mxu1 %v1519_v17  ;;  %807 = vmatpush1.msra.mxu0 %v673_v30 }
  0x95   : > { %1216 = vmatpush1.msra.mxu1 %v673_v30  ;;  %808 = vmatprep.subr.mxu0 %v1519_v17 }
  0x96   : > { %1189 = vmatprep.subr.mxu1 %v1519_v17  ;;  %809 = vmatpush1.msra.mxu0 %v672_v31 }
  0x97   : > { %1217 = vmatpush1.msra.mxu1 %v672_v31  ;;  %810 = vmatprep.subr.mxu0 %v1519_v17 }
  0x98   : > { %1190 = vmatprep.subr.mxu1 %v1519_v17  ;;  %811 = vmatpush1.msra.mxu0 %v671_v32 }
  0x99   : > { %1218 = vmatpush1.msra.mxu1 %v671_v32  ;;  %812 = vmatprep.subr.mxu0 %v1519_v17 }
  0x9a   : > { %1191 = vmatprep.subr.mxu1 %v1519_v17  ;;  %813 = vmatpush1.msra.mxu0 %v670_v33 }
  0x9b   : > { %1219 = vmatpush1.msra.mxu1 %v670_v33  ;;  %822 = vmatprep.subr.mxu0 %v1519_v17 }
  0x9c   : > { %1192 = vmatprep.subr.mxu1 %v1519_v17  ;;  %823 = vmatpush2.msra.mxu0 %v697_v34 }
  0x9d   : > { %1220 = vmatpush2.msra.mxu1 %v697_v34  ;;  %824 = vmatprep.subr.mxu0 %v1519_v17 }
  0x9e   : > { %1193 = vmatprep.subr.mxu1 %v1519_v17  ;;  %825 = vmatpush2.msra.mxu0 %v696_v35 }
  0x9f   : > { %1221 = vmatpush2.msra.mxu1 %v696_v35  ;;  %826 = vmatprep.subr.mxu0 %v1519_v17 }
  0xa0   : > { %1194 = vmatprep.subr.mxu1 %v1519_v17  ;;  %827 = vmatpush2.msra.mxu0 %v695_v36 }
  0xa1   : > { %1222 = vmatpush2.msra.mxu1 %v695_v36  ;;  %828 = vmatprep.subr.mxu0 %v1519_v17 }
  0xa2   : > { %1195 = vmatprep.subr.mxu1 %v1519_v17  ;;  %829 = vmatpush2.msra.mxu0 %v694_v37 }
  0xa3   : > { %1223 = vmatpush2.msra.mxu1 %v694_v37  ;;  %830 = vmatprep.subr.mxu0 %v1519_v17 }
  0xa4   : > { %1196 = vmatprep.subr.mxu1 %v1519_v17  ;;  %831 = vmatpush2.msra.mxu0 %v693_v38 }
  0xa5   : > { %1224 = vmatpush2.msra.mxu1 %v693_v38  ;;  %832 = vmatprep.subr.mxu0 %v1519_v17 }
  0xa6   : > { %1197 = vmatprep.subr.mxu1 %v1519_v17  ;;  %833 = vmatpush2.msra.mxu0 %v692_v39 }
  0xa7   : > { %1225 = vmatpush2.msra.mxu1 %v692_v39  ;;  %834 = vmatprep.subr.mxu0 %v1519_v17 }
  0xa8   : > { %1198 = vmatprep.subr.mxu1 %v1519_v17  ;;  %835 = vmatpush2.msra.mxu0 %v691_v40 }
  0xa9   : > { %1226 = vmatpush2.msra.mxu1 %v691_v40  ;;  %836 = vmatprep.subr.mxu0 %v1519_v17 }
  0xaa   : > { %1199 = vmatprep.subr.mxu1 %v1519_v17  ;;  %837 = vmatpush2.msra.mxu0 %v690_v41 }
  0xab   : > { %1227 = vmatpush2.msra.mxu1 %v690_v41  ;;  %838 = vmatprep.subr.mxu0 %v1519_v17 }
  0xac   : > { %1200 = vmatprep.subr.mxu1 %v1519_v17  ;;  %839 = vmatpush2.msra.mxu0 %v689_v42 }
  0xad   : > { %1228 = vmatpush2.msra.mxu1 %v689_v42  ;;  %840 = vmatprep.subr.mxu0 %v1519_v17 }
  0xae   : > { %1201 = vmatprep.subr.mxu1 %v1519_v17  ;;  %841 = vmatpush2.msra.mxu0 %v688_v43 }
  0xaf   : > { %1229 = vmatpush2.msra.mxu1 %v688_v43  ;;  %842 = vmatprep.subr.mxu0 %v1519_v17 }
  0xb0   : > { %1202 = vmatprep.subr.mxu1 %v1519_v17  ;;  %843 = vmatpush2.msra.mxu0 %v687_v44 }
  0xb1   : > { %1230 = vmatpush2.msra.mxu1 %v687_v44  ;;  %844 = vmatprep.subr.mxu0 %v1519_v17  ;;  %v524_v44 = vld [vmem:[%s2048_s4] sm:$0x3] }
  0xb2   : > { %1203 = vmatprep.subr.mxu1 %v1519_v17  ;;  %845 = vmatpush2.msra.mxu0 %v686_v45  ;;  %v441_v17 = vld [vmem:[#allocation5 + $0x58] sm:$0xff] }
  0xb3   : > { %1231 = vmatpush2.msra.mxu1 %v686_v45 }
 0x101   : > { %v384_v52 = vpop.xlane.xlu0 %383  ;;  %v392_v53 = vpop.xlane.xlu1 %391 }
 0x102   : > { %v416_v54 = vadd.f32 %v409_v50, %v384_v52  ;;  %v418_v55 = vadd.f32 %v411_v51, %v392_v53  ;;  %v430_v50 = vld [vmem:[#allocation5] sm:$0xff] }
 0x104   : > { %v423_v58 = vmax.f32 %v416_v54, 0.0  ;;  %v425_v61 = vmax.f32 %v418_v55, 0.0 }
 0x105   : > { %v388_v59 = vpop.xlane.xlu0 %387  ;;  %v396_v60 = vpop.xlane.xlu1 %395 }
 0x106   : > { %v417_v62 = vadd.f32 %v410_v56, %v388_v59  ;;  %446 = vperm.xlu1 %1320, %v423_v58   ;;  %v419_v63 = vadd.f32 %v412_v57, %v396_v60  ;;  %v435_v56 = vld [vmem:[#allocation5 + $0x28] sm:$0xff]  ;;  %v434_v59 = vld [vmem:[#allocation5 + $0x20] sm:$0xff]  ;;  %v437_v60 = vld [vmem:[#allocation5 + $0x38] sm:$0xff] }
 0x108   : > { %v424_v4 = vmax.f32 %v417_v62, 0.0  ;;  %v426_v6 = vmax.f32 %v419_v63, 0.0 }
 0x109   : > { %v400_v5 = vpop.xlane.xlu0 %399  ;;  %v404_v9 = vpop.xlane.xlu1 %403 }
 0x10a   : > { %456 = vperm.xlu1 %1320, %v425_v61   ;;  %451 = vperm.xlu0 %1321, %v424_v4   ;;  %v420_v7 = vadd.f32 %v413_v0, %v400_v5  ;;  %v421_v11 = vadd.f32 %v414_v8, %v404_v9  ;;  %v436_v5 = vld [vmem:[#allocation5 + $0x30] sm:$0xff]  ;;  %v438_v9 = vld [vmem:[#allocation5 + $0x40] sm:$0xff] }
 0x10c   : > { %v427_v10 = vmax.f32 %v420_v7, 0.0  ;;  %v428_v14 = vmax.f32 %v421_v11, 0.0 }
 0x10d   : > { %v408_v13 = vpop.xlane.xlu0 %407 }
 0x10e   : > { %461 = vperm.xlu1 %1320, %v426_v6   ;;  %v422_v15 = vadd.f32 %v415_v12, %v408_v13  ;;  %v439_v6 = vld [vmem:[#allocation5 + $0x48] sm:$0xff] }
 0x110   : > { %v429_v16 = vmax.f32 %v422_v15, 0.0 }
 0x112   : > { %466 = vperm.xlu1 %1320, %v427_v10  }
 0x116   : > { %471 = vperm.xlu1 %1320, %v428_v14  }
 0x11a   : > { %476 = vperm.xlu1 %1320, %v429_v16   ;;  %v440_v16 = vld [vmem:[#allocation5 + $0x50] sm:$0xff] }
 0x181   : > { %v447_v46 = vpop.permute.xlu1 %446 }
 0x182   : > { %v480_v53 = vmul.f32 %v447_v46, %v431_v47  ;;  %v479_v57 = vmul.f32 %v447_v46, %v430_v50  ;;  %v533_v50 = vrot.slane %v524_v44, %v362_v3  ;;  %v551_v3 = vld [vmem:[#allocation7 + $0x8] sm:$0xff] }
 0x184   : > { %v505_v62 = vsel %vm380_vm0, %v480_v53, 0.0 }
 0x185   : > { %v457_v51 = vpop.permute.xlu1 %456  ;;  %v452_v52 = vpop.permute.xlu0 %451 }
 0x186   : > { %v481_v54 = vmul.f32 %v452_v52, %v432_v48  ;;  %v482_v55 = vmul.f32 %v452_v52, %v433_v49  ;;  %v484_v63 = vmul.f32 %v457_v51, %v435_v56  ;;  %v483_v7 = vmul.f32 %v457_v51, %v434_v59 }
 0x187   : > { %v529_v48 = vrot.slane %v524_v44, %v1738_v2 }
 0x188   : > { %v506_v58 = vsel %vm380_vm0, %v482_v55, 0.0  ;;  %v493_v0 = vadd.f32 %v481_v54, %v479_v57  ;;  %v508_v11 = vsel %vm380_vm0, %v484_v63, 0.0 }
 0x189   : > { %v462_v61 = vpop.permute.xlu1 %461  ;;  %v507_v4 = vadd.f32 %v506_v58, %v505_v62 }
 0x18a   : > { %v486_v8 = vmul.f32 %v462_v61, %v437_v60  ;;  %v494_v12 = vadd.f32 %v493_v0, %v483_v7  ;;  %v485_v13 = vmul.f32 %v462_v61, %v436_v5  ;;  %v579_v0 = vld [vmem:[#allocation7 + $0xe8] sm:$0xff]  ;;  %v550_v5 = vld [vmem:[#allocation7] sm:$0xff]  ;;  %v553_v7 = vld [vmem:[#allocation7 + $0x18] sm:$0xff] }
 0x18b   : > { %v509_v15 = vadd.f32 %v508_v11, %v507_v4 }
 0x18c   : > { %v510_v18 = vsel %vm380_vm0, %v486_v8, 0.0  ;;  %v495_v21 = vadd.f32 %v494_v12, %v485_v13  ;;  %v581_v8 = vld [vmem:[#allocation7 + $0xf8] sm:$0xff] }
 0x18d   : > { %v467_v10 = vpop.permute.xlu1 %466  ;;  %v511_v25 = vadd.f32 %v510_v18, %v509_v15  ;;  %v580_v15 = vld [vmem:[#allocation7 + $0xf0] sm:$0xff] }
 0x18e   : > { %v488_v14 = vmul.f32 %v467_v10, %v439_v6  ;;  %v487_v19 = vmul.f32 %v467_v10, %v438_v9  ;;  %v578_v6 = vld [vmem:[#allocation7 + $0xe0] sm:$0xff] }
 0x190   : > { %v512_v22 = vsel %vm380_vm0, %v488_v14, 0.0  ;;  %v496_v28 = vadd.f32 %v495_v21, %v487_v19  ;;  %v552_v14 = vld [vmem:[#allocation7 + $0x10] sm:$0xff] }
 0x191   : > { %v472_v20 = vpop.permute.xlu1 %471  ;;  %v513_v30 = vadd.f32 %v512_v22, %v511_v25  ;;  %v554_v22 = vld [vmem:[#allocation7 + $0x20] sm:$0xff]  ;;  %v585_v25 = vld [vmem:[#allocation7 + $0x118] sm:$0xff] }
 0x192   : > { %v489_v23 = vmul.f32 %v472_v20, %v440_v16  ;;  %v490_v24 = vmul.f32 %v472_v20, %v441_v17  ;;  %v555_v16 = vld [vmem:[#allocation7 + $0x28] sm:$0xff] }
 0x193   : > { %v583_v17 = vld [vmem:[#allocation7 + $0x108] sm:$0xff] }
 0x194   : > { %v514_v29 = vsel %vm380_vm0, %v490_v24, 0.0  ;;  %v497_v32 = vadd.f32 %v496_v28, %v489_v23  ;;  %v582_v23 = vld [vmem:[#allocation7 + $0x100] sm:$0xff]  ;;  %v557_v24 = vld [vmem:[#allocation7 + $0x38] sm:$0xff] }
 0x195   : > { %v477_v31 = vpop.permute.xlu1 %476  ;;  %v515_v35 = vadd.f32 %v514_v29, %v513_v30  ;;  %v556_v30 = vld [vmem:[#allocation7 + $0x30] sm:$0xff] }
 0x196   : > { %v491_v33 = vmul.f32 %v477_v31, %v442_v26  ;;  %v492_v34 = vmul.f32 %v477_v31, %v443_v27  ;;  %v584_v31 = vld [vmem:[#allocation7 + $0x110] sm:$0xff] }
 0x198   : > { %v498_v36 = vadd.f32 %v497_v32, %v491_v33  ;;  %v516_v37 = vsel %vm380_vm0, %v492_v34, 0.0  ;;  %v559_v32 = vld [vmem:[#allocation7 + $0x48] sm:$0xff] }
 0x199   : > { %v517_v38 = vadd.f32 %v516_v37, %v515_v35  ;;  %v587_v33 = vld [vmem:[#allocation7 + $0x128] sm:$0xff] }
 0x19a   : > { %v499_v39 = vrot.slane %v498_v36, 4 }
 0x19b   : > { %v518_v40 = vrot.slane %v517_v38, 4 }
 0x19c   : > { %v500_v41 = vadd.f32 %v499_v39, %v498_v36  ;;  %v586_v39 = vld [vmem:[#allocation7 + $0x120] sm:$0xff] }
 0x19d   : > { %v519_v42 = vadd.f32 %v518_v40, %v517_v38  ;;  %v558_v38 = vld [vmem:[#allocation7 + $0x40] sm:$0xff]  ;;  %v561_v40 = vld [vmem:[#allocation7 + $0x58] sm:$0xff] }
 0x19e   : > { %v501_v43 = vrot.slane %v500_v41, 2 }
 0x19f   : > { %v520_v45 = vrot.slane %v519_v42, 2 }
 0x1a0   : > { %v502_v46 = vadd.f32 %v501_v43, %v500_v41  ;;  %v589_v41 = vld [vmem:[#allocation7 + $0x138] sm:$0xff] }
 0x1a1   : > { %v521_v47 = vadd.f32 %v520_v45, %v519_v42 }
 0x1a2   : > { %v503_v49 = vrot.slane %v502_v46, 1 }
 0x1a3   : > { %v522_v51 = vrot.slane %v521_v47, 1 }
 0x1a4   : > { %v504_v52 = vadd.f32 %v503_v49, %v502_v46  ;;  %v560_v46 = vld [vmem:[#allocation7 + $0x50] sm:$0xff]  ;;  %v591_v49 = vld [vmem:[#allocation7 + $0x148] sm:$0xff] }
 0x1a5   : > { %v523_v53 = vadd.f32 %v522_v51, %v521_v47  ;;  %v588_v47 = vld [vmem:[#allocation7 + $0x130] sm:$0xff] }
 0x1a6   : > { %v536_v54 = vadd.f32 %v529_v48, %v504_v52  ;;  %v563_v48 = vld [vmem:[#allocation7 + $0x68] sm:$0xff] }
 0x1a7   : > { %v537_v55 = vadd.f32 %v533_v50, %v523_v53 }
 0x1a8   : > { %v1143_v56 = vmul.f32 -1.442695, %v536_v54  ;;  %v562_v54 = vld [vmem:[#allocation7 + $0x60] sm:$0xff] }
 0x1a9   : > { %v1144_v57 = vmul.f32 -1.442695, %v537_v55  ;;  %v590_v55 = vld [vmem:[#allocation7 + $0x140] sm:$0xff] }
 0x1aa   : > { %1322 = vpow2.f32 %v1143_v56  ;;  %v565_v56 = vld [vmem:[#allocation7 + $0x78] sm:$0xff] }
 0x1ab   : > { %1324 = vpow2.f32 %v1144_v57  ;;  %v593_v57 = vld [vmem:[#allocation7 + $0x158] sm:$0xff] }
 0x1b7   : > { %v1323_v58 = vpop.eup %1322 }
 0x1b8   : > { %v1325_v59 = vpop.eup %1324  ;;  %v544_v60 = vadd.f32 1.0, %v1323_v58 }
 0x1b9   : > { %v545_v61 = vadd.f32 1.0, %v1325_v59 }
 0x1ba   : > { %1326 = vrcp.f32 %v544_v60 }
 0x1bb   : > { %1328 = vrcp.f32 %v545_v61 }
 0x1c7   : > { %v1327_v62 = vpop.eup %1326 }
 0x1c8   : > { %v1329_v63 = vpop.eup %1328  ;;  %v1873_v1 = vrot.slane %v1327_v62, %v1738_v2  ;;  %v564_v62 = vld [vmem:[#allocation7 + $0x70] sm:$0xff] }
 0x1c9   : > { %v1876_v4 = vrot.slane %v1329_v63, %v1738_v2  ;;  %v592_v63 = vld [vmem:[#allocation7 + $0x150] sm:$0xff] }
 0x1ca   : > { %v614_v11 = vmul.f32 %v1873_v1, %v550_v5  ;;  %v642_v12 = vmul.f32 %v1873_v1, %v578_v6  ;;  %v616_v18 = vmul.f32 %v1873_v1, %v552_v14  ;;  %v644_v19 = vmul.f32 %v1873_v1, %v580_v15 }
 0x1cb   : > { %v615_v9 = vmul.f32 %v1876_v4, %v551_v3  ;;  %v643_v10 = vmul.f32 %v1876_v4, %v579_v0  ;;  %v617_v13 = vmul.f32 %v1876_v4, %v553_v7  ;;  %v645_v2 = vmul.f32 %v1876_v4, %v581_v8  ;;  %v567_v3 = vld [vmem:[#allocation7 + $0x88] sm:$0xff] }
 0x1cc   : > { %v619_v20 = vmul.f32 %v1876_v4, %v555_v16  ;;  %v647_v21 = vmul.f32 %v1876_v4, %v583_v17  ;;  %v618_v26 = vmul.f32 %v1873_v1, %v554_v22  ;;  %v646_v27 = vmul.f32 %v1873_v1, %v582_v23  ;;  %v595_v0 = vld [vmem:[#allocation7 + $0x168] sm:$0xff]  ;;  %v568_v16 = vld [vmem:[#allocation7 + $0x90] sm:$0xff] }
 0x1cd   : > { %1145 = vmatprep.mubr.msk.f32.mxu0 %vm380_vm0, %v615_v9  ;;  %1159 = vmatprep.mubr.msk.f32.mxu1 %vm380_vm0, %v643_v10  ;;  %v621_v28 = vmul.f32 %v1876_v4, %v557_v24  ;;  %v649_v29 = vmul.f32 %v1876_v4, %v585_v25  ;;  %v620_v34 = vmul.f32 %v1873_v1, %v556_v30  ;;  %v566_v9 = vld [vmem:[#allocation7 + $0x80] sm:$0xff]  ;;  %v596_v17 = vld [vmem:[#allocation7 + $0x170] sm:$0xff] }
 0x1ce   : > { %847 = vmatmul.mubr.f32.vlgmr.msra.gmra.mxu0 %v614_v11  ;;  %917 = vmatmul.mubr.f32.vlgmr.msra.gmra.mxu1 %v642_v12  ;;  %v648_v35 = vmul.f32 %v1873_v1, %v584_v31  ;;  %v623_v36 = vmul.f32 %v1876_v4, %v559_v32  ;;  %v651_v37 = vmul.f32 %v1876_v4, %v587_v33  ;;  %v594_v10 = vld [vmem:[#allocation7 + $0x160] sm:$0xff]  ;;  %v569_v11 = vld [vmem:[#allocation7 + $0x98] sm:$0xff]  ;;  %v572_v32 = vld [vmem:[#allocation7 + $0xb0] sm:$0xff] }
 0x1cf   : > { %1146 = vmatprep.mubr.msk.f32.mxu0 %vm380_vm0, %v617_v13  ;;  %1160 = vmatprep.mubr.msk.f32.mxu1 %vm380_vm0, %v645_v2  ;;  %v622_v42 = vmul.f32 %v1873_v1, %v558_v38  ;;  %v650_v43 = vmul.f32 %v1873_v1, %v586_v39  ;;  %v625_v44 = vmul.f32 %v1876_v4, %v561_v40  ;;  %v597_v12 = vld [vmem:[#allocation7 + $0x178] sm:$0xff]  ;;  %v570_v24 = vld [vmem:[#allocation7 + $0xa0] sm:$0xff]  ;;  %v600_v33 = vld [vmem:[#allocation7 + $0x190] sm:$0xff] }
 0x1d0   : > { %v653_v45 = vmul.f32 %v1876_v4, %v589_v41  ;;  %v624_v50 = vmul.f32 %v1873_v1, %v560_v46  ;;  %v652_v51 = vmul.f32 %v1873_v1, %v588_v47  ;;  %v627_v52 = vmul.f32 %v1876_v4, %v563_v48  ;;  %v598_v25 = vld [vmem:[#allocation7 + $0x180] sm:$0xff]  ;;  %v576_v48 = vld [vmem:[#allocation7 + $0xd0] sm:$0xff] }
 0x1d1   : > { %v655_v53 = vmul.f32 %v1876_v4, %v591_v49  ;;  %v626_v58 = vmul.f32 %v1873_v1, %v562_v54  ;;  %v654_v59 = vmul.f32 %v1873_v1, %v590_v55  ;;  %v629_v60 = vmul.f32 %v1876_v4, %v565_v56  ;;  %v574_v40 = vld [vmem:[#allocation7 + $0xc0] sm:$0xff]  ;;  %v604_v49 = vld [vmem:[#allocation7 + $0x1b0] sm:$0xff] }
 0x1d2   : > { %852 = vmatmul.mubr.f32.gmra.mxu0 %v616_v18  ;;  %922 = vmatmul.mubr.f32.gmra.mxu1 %v644_v19  ;;  %v657_v61 = vmul.f32 %v1876_v4, %v593_v57  ;;  %v628_v5 = vmul.f32 %v1873_v1, %v564_v62  ;;  %v656_v6 = vmul.f32 %v1873_v1, %v592_v63  ;;  %v571_v18 = vld [vmem:[#allocation7 + $0xa8] sm:$0xff]  ;;  %v602_v41 = vld [vmem:[#allocation7 + $0x1a0] sm:$0xff] }
 0x1d3   : > { %1147 = vmatprep.mubr.msk.f32.mxu0 %vm380_vm0, %v619_v20  ;;  %1161 = vmatprep.mubr.msk.f32.mxu1 %vm380_vm0, %v647_v21  ;;  %v631_v7 = vmul.f32 %v1876_v4, %v567_v3  ;;  %v659_v8 = vmul.f32 %v1876_v4, %v595_v0  ;;  %v630_v13 = vmul.f32 %v1873_v1, %v566_v9  ;;  %v599_v19 = vld [vmem:[#allocation7 + $0x188] sm:$0xff] }
 0x1d4   : > { %v658_v2 = vmul.f32 %v1873_v1, %v594_v10  ;;  %v633_v14 = vmul.f32 %v1876_v4, %v569_v11  ;;  %v661_v15 = vmul.f32 %v1876_v4, %v597_v12  ;;  %v632_v20 = vmul.f32 %v1873_v1, %v568_v16 }
 0x1d5   : > { %v660_v21 = vmul.f32 %v1873_v1, %v596_v17  ;;  %v635_v22 = vmul.f32 %v1876_v4, %v571_v18  ;;  %v663_v23 = vmul.f32 %v1876_v4, %v599_v19 }
 0x1d6   : > { %857 = vmatmul.mubr.f32.gmra.mxu0 %v618_v26  ;;  %927 = vmatmul.mubr.f32.gmra.mxu1 %v646_v27  ;;  %v573_v26 = vld [vmem:[#allocation7 + $0xb8] sm:$0xff] }
 0x1d7   : > { %1148 = vmatprep.mubr.msk.f32.mxu0 %vm380_vm0, %v621_v28  ;;  %1162 = vmatprep.mubr.msk.f32.mxu1 %vm380_vm0, %v649_v29  ;;  %v601_v27 = vld [vmem:[#allocation7 + $0x198] sm:$0xff]  ;;  %v634_v28 = vmul.f32 %v1873_v1, %v570_v24  ;;  %v662_v29 = vmul.f32 %v1873_v1, %v598_v25  ;;  %v637_v30 = vmul.f32 %v1876_v4, %v573_v26 }
 0x1d8   : > { %v665_v31 = vmul.f32 %v1876_v4, %v601_v27 }
 0x1da   : > { %862 = vmatmul.mubr.f32.gmra.mxu0 %v620_v34  ;;  %932 = vmatmul.mubr.f32.gmra.mxu1 %v648_v35  ;;  %v575_v34 = vld [vmem:[#allocation7 + $0xc8] sm:$0xff] }
 0x1db   : > { %1149 = vmatprep.mubr.msk.f32.mxu0 %vm380_vm0, %v623_v36  ;;  %1163 = vmatprep.mubr.msk.f32.mxu1 %vm380_vm0, %v651_v37  ;;  %v603_v35 = vld [vmem:[#allocation7 + $0x1a8] sm:$0xff]  ;;  %v636_v36 = vmul.f32 %v1873_v1, %v572_v32  ;;  %v664_v37 = vmul.f32 %v1873_v1, %v600_v33  ;;  %v639_v38 = vmul.f32 %v1876_v4, %v575_v34 }
 0x1dc   : > { %v667_v39 = vmul.f32 %v1876_v4, %v603_v35 }
 0x1de   : > { %867 = vmatmul.mubr.f32.gmra.mxu0 %v622_v42  ;;  %937 = vmatmul.mubr.f32.gmra.mxu1 %v650_v43  ;;  %v577_v42 = vld [vmem:[#allocation7 + $0xd8] sm:$0xff] }
 0x1df   : > { %1150 = vmatprep.mubr.msk.f32.mxu0 %vm380_vm0, %v625_v44  ;;  %1164 = vmatprep.mubr.msk.f32.mxu1 %vm380_vm0, %v653_v45  ;;  %v605_v43 = vld [vmem:[#allocation7 + $0x1b8] sm:$0xff]  ;;  %v638_v44 = vmul.f32 %v1873_v1, %v574_v40  ;;  %v666_v45 = vmul.f32 %v1873_v1, %v602_v41  ;;  %v641_v46 = vmul.f32 %v1876_v4, %v577_v42 }
 0x1e0   : > { %v669_v47 = vmul.f32 %v1876_v4, %v605_v43 }
 0x1e2   : > { %872 = vmatmul.mubr.f32.gmra.mxu0 %v624_v50  ;;  %942 = vmatmul.mubr.f32.gmra.mxu1 %v652_v51  ;;  %v640_v50 = vmul.f32 %v1873_v1, %v576_v48  ;;  %v668_v51 = vmul.f32 %v1873_v1, %v604_v49 }
 0x1e3   : > { %1151 = vmatprep.mubr.msk.f32.mxu0 %vm380_vm0, %v627_v52  ;;  %1165 = vmatprep.mubr.msk.f32.mxu1 %vm380_vm0, %v655_v53 }
 0x1e6   : > { %877 = vmatmul.mubr.f32.gmra.mxu0 %v626_v58  ;;  %947 = vmatmul.mubr.f32.gmra.mxu1 %v654_v59 }
 0x1e7   : > { %1152 = vmatprep.mubr.msk.f32.mxu0 %vm380_vm0, %v629_v60  ;;  %1166 = vmatprep.mubr.msk.f32.mxu1 %vm380_vm0, %v657_v61 }
 0x1ea   : > { %882 = vmatmul.mubr.f32.gmra.mxu0 %v628_v5  ;;  %952 = vmatmul.mubr.f32.gmra.mxu1 %v656_v6 }
 0x1eb   : > { %1153 = vmatprep.mubr.msk.f32.mxu0 %vm380_vm0, %v631_v7  ;;  %1167 = vmatprep.mubr.msk.f32.mxu1 %vm380_vm0, %v659_v8 }
 0x1ee   : > { %887 = vmatmul.mubr.f32.gmra.mxu0 %v630_v13  ;;  %957 = vmatmul.mubr.f32.gmra.mxu1 %v658_v2 }
 0x1ef   : > { %1154 = vmatprep.mubr.msk.f32.mxu0 %vm380_vm0, %v633_v14  ;;  %1168 = vmatprep.mubr.msk.f32.mxu1 %vm380_vm0, %v661_v15 }
 0x1f2   : > { %892 = vmatmul.mubr.f32.gmra.mxu0 %v632_v20  ;;  %962 = vmatmul.mubr.f32.gmra.mxu1 %v660_v21 }
 0x1f3   : > { %1155 = vmatprep.mubr.msk.f32.mxu0 %vm380_vm0, %v635_v22  ;;  %1169 = vmatprep.mubr.msk.f32.mxu1 %vm380_vm0, %v663_v23 }
 0x1f6   : > { %897 = vmatmul.mubr.f32.gmra.mxu0 %v634_v28  ;;  %967 = vmatmul.mubr.f32.gmra.mxu1 %v662_v29 }
 0x1f7   : > { %1156 = vmatprep.mubr.msk.f32.mxu0 %vm380_vm0, %v637_v30  ;;  %1170 = vmatprep.mubr.msk.f32.mxu1 %vm380_vm0, %v665_v31 }
 0x1fa   : > { %902 = vmatmul.mubr.f32.gmra.mxu0 %v636_v36  ;;  %972 = vmatmul.mubr.f32.gmra.mxu1 %v664_v37 }
 0x1fb   : > { %1157 = vmatprep.mubr.msk.f32.mxu0 %vm380_vm0, %v639_v38  ;;  %1171 = vmatprep.mubr.msk.f32.mxu1 %vm380_vm0, %v667_v39 }
 0x1fe   : > { %907 = vmatmul.mubr.f32.gmra.mxu0 %v638_v44  ;;  %977 = vmatmul.mubr.f32.gmra.mxu1 %v666_v45 }
 0x1ff   : > { %1158 = vmatprep.mubr.msk.f32.mxu0 %vm380_vm0, %v641_v46  ;;  %1172 = vmatprep.mubr.msk.f32.mxu1 %vm380_vm0, %v669_v47 }
 0x202   : > { %912 = vmatmul.mubr.f32.gmra.mxu0 %v640_v50  ;;  %982 = vmatmul.mubr.f32.gmra.mxu1 %v668_v51 }
 0x28e   : > { %v848_v52 = vpop.f32.mrf.mxu0  ;;  %v918_v53 = vpop.f32.mrf.mxu1 }
 0x28f   : > { %987 = vst [vmem:[%s1964_s21] sm:$0xff] %v848_v52  ;;  %1001 = vst [vmem:[%s1964_s21 + $0x70] sm:$0xff] %v918_v53 }
 0x290   : > { %v850_v4 = vpop.f32.mrf.mxu0  ;;  %v920_v54 = vpop.f32.mrf.mxu1 }
 0x292   : > { %v853_v1 = vpop.f32.mrf.mxu0  ;;  %v923_v55 = vpop.f32.mrf.mxu1 }
 0x293   : > { %988 = vst [vmem:[%s1964_s21 + $0x8] sm:$0xff] %v853_v1  ;;  %1002 = vst [vmem:[%s1964_s21 + $0x78] sm:$0xff] %v923_v55 }
 0x294   : > { %v855_v56 = vpop.f32.mrf.mxu0  ;;  %v925_v57 = vpop.f32.mrf.mxu1 }
 0x296   : > { %v858_v58 = vpop.f32.mrf.mxu0  ;;  %v928_v59 = vpop.f32.mrf.mxu1 }
 0x297   : > { %989 = vst [vmem:[%s1964_s21 + $0x10] sm:$0xff] %v858_v58  ;;  %1003 = vst [vmem:[%s1964_s21 + $0x80] sm:$0xff] %v928_v59 }
 0x298   : > { %v860_v60 = vpop.f32.mrf.mxu0  ;;  %v930_v61 = vpop.f32.mrf.mxu1 }
 0x29a   : > { %v863_v62 = vpop.f32.mrf.mxu0  ;;  %v933_v63 = vpop.f32.mrf.mxu1 }
 0x29b   : > { %990 = vst [vmem:[%s1964_s21 + $0x18] sm:$0xff] %v863_v62  ;;  %1004 = vst [vmem:[%s1964_s21 + $0x88] sm:$0xff] %v933_v63 }
 0x29c   : > { %v865_v3 = vpop.f32.mrf.mxu0  ;;  %v935_v0 = vpop.f32.mrf.mxu1 }
 0x29e   : > { %v868_v5 = vpop.f32.mrf.mxu0  ;;  %v938_v6 = vpop.f32.mrf.mxu1 }
 0x29f   : > { %991 = vst [vmem:[%s1964_s21 + $0x20] sm:$0xff] %v868_v5  ;;  %1005 = vst [vmem:[%s1964_s21 + $0x90] sm:$0xff] %v938_v6 }
 0x2a0   : > { %v870_v7 = vpop.f32.mrf.mxu0  ;;  %v940_v8 = vpop.f32.mrf.mxu1 }
 0x2a2   : > { %v873_v9 = vpop.f32.mrf.mxu0  ;;  %v943_v10 = vpop.f32.mrf.mxu1 }
 0x2a3   : > { %992 = vst [vmem:[%s1964_s21 + $0x28] sm:$0xff] %v873_v9  ;;  %1006 = vst [vmem:[%s1964_s21 + $0x98] sm:$0xff] %v943_v10 }
 0x2a4   : > { %v875_v11 = vpop.f32.mrf.mxu0  ;;  %v945_v12 = vpop.f32.mrf.mxu1 }
 0x2a6   : > { %v878_v13 = vpop.f32.mrf.mxu0  ;;  %v948_v2 = vpop.f32.mrf.mxu1 }
 0x2a7   : > { %993 = vst [vmem:[%s1964_s21 + $0x30] sm:$0xff] %v878_v13  ;;  %1007 = vst [vmem:[%s1964_s21 + $0xa0] sm:$0xff] %v948_v2 }
 0x2a8   : > { %v880_v14 = vpop.f32.mrf.mxu0  ;;  %v950_v15 = vpop.f32.mrf.mxu1 }
 0x2aa   : > { %v883_v16 = vpop.f32.mrf.mxu0  ;;  %v953_v17 = vpop.f32.mrf.mxu1 }
 0x2ab   : > { %994 = vst [vmem:[%s1964_s21 + $0x38] sm:$0xff] %v883_v16  ;;  %1008 = vst [vmem:[%s1964_s21 + $0xa8] sm:$0xff] %v953_v17 }
 0x2ac   : > { %v885_v18 = vpop.f32.mrf.mxu0  ;;  %v955_v19 = vpop.f32.mrf.mxu1 }
 0x2ae   : > { %v888_v20 = vpop.f32.mrf.mxu0  ;;  %v958_v21 = vpop.f32.mrf.mxu1 }
 0x2af   : > { %995 = vst [vmem:[%s1964_s21 + $0x40] sm:$0xff] %v888_v20  ;;  %1009 = vst [vmem:[%s1964_s21 + $0xb0] sm:$0xff] %v958_v21 }
 0x2b0   : > { %v890_v22 = vpop.f32.mrf.mxu0  ;;  %v960_v23 = vpop.f32.mrf.mxu1 }
 0x2b2   : > { %v893_v24 = vpop.f32.mrf.mxu0  ;;  %v963_v25 = vpop.f32.mrf.mxu1 }
 0x2b3   : > { %996 = vst [vmem:[%s1964_s21 + $0x48] sm:$0xff] %v893_v24  ;;  %1010 = vst [vmem:[%s1964_s21 + $0xb8] sm:$0xff] %v963_v25 }
 0x2b4   : > { %v895_v26 = vpop.f32.mrf.mxu0  ;;  %v965_v27 = vpop.f32.mrf.mxu1 }
 0x2b6   : > { %v898_v28 = vpop.f32.mrf.mxu0  ;;  %v968_v29 = vpop.f32.mrf.mxu1 }
 0x2b7   : > { %997 = vst [vmem:[%s1964_s21 + $0x50] sm:$0xff] %v898_v28  ;;  %1011 = vst [vmem:[%s1964_s21 + $0xc0] sm:$0xff] %v968_v29 }
 0x2b8   : > { %v900_v30 = vpop.f32.mrf.mxu0  ;;  %v970_v31 = vpop.f32.mrf.mxu1 }
 0x2ba   : > { %v903_v32 = vpop.f32.mrf.mxu0  ;;  %v973_v33 = vpop.f32.mrf.mxu1 }
 0x2bb   : > { %998 = vst [vmem:[%s1964_s21 + $0x58] sm:$0xff] %v903_v32  ;;  %1012 = vst [vmem:[%s1964_s21 + $0xc8] sm:$0xff] %v973_v33 }
 0x2bc   : > { %v905_v34 = vpop.f32.mrf.mxu0  ;;  %v975_v35 = vpop.f32.mrf.mxu1 }
 0x2be   : > { %v908_v36 = vpop.f32.mrf.mxu0  ;;  %v978_v37 = vpop.f32.mrf.mxu1 }
 0x2bf   : > { %999 = vst [vmem:[%s1964_s21 + $0x60] sm:$0xff] %v908_v36  ;;  %1013 = vst [vmem:[%s1964_s21 + $0xd0] sm:$0xff] %v978_v37 }
 0x2c0   : > { %v910_v38 = vpop.f32.mrf.mxu0  ;;  %v980_v39 = vpop.f32.mrf.mxu1 }
 0x2c2   : > { %v913_v40 = vpop.f32.mrf.mxu0  ;;  %v983_v41 = vpop.f32.mrf.mxu1 }
 0x2c3   : > { %1000 = vst [vmem:[%s1964_s21 + $0x68] sm:$0xff] %v913_v40  ;;  %1014 = vst [vmem:[%s1964_s21 + $0xd8] sm:$0xff] %v983_v41 }
 0x2c4   : > { %v915_v42 = vpop.f32.mrf.mxu0  ;;  %v985_v43 = vpop.f32.mrf.mxu1 }
 0x2c5   : > { %1449 = shalt.err (!%p1446_p10)
}
 0x2c6   : > { %s1450_s23 = scalar_lea.hbm %s1997_s29, 3584  ;;  %s1454_s8 = scalar_lea.hbm %s2051_s7, 7168 }
 0x2c7   : > { %p1451_p6 = scmp.ne.s32.totalorder %s1997_s29, %s1450_s23  ;;  %p1455_p11 = scmp.lt.s32.totalorder %s1997_s29, %s2051_s7 }
 0x2c8   : > { %p1456_p13 = scmp.lt.s32.totalorder %s1454_s8, %s1450_s23 }
 0x2c9   : > { %p1452_p1 = pnand %p1451_p6, %p2074_p0 }
 0x2ca   : > { %p1457_p7 = por %p1456_p13, %p1455_p11 }
 0x2cb   : > { %p1453_p5 = pneg %p1452_p1 }
 0x2cd   : > { %p1458_p12 = pnand %p1457_p7, %p1453_p5 }
 0x2cf   : > { %1461 = shalt.err (!%p1458_p12)
}
 0x2d0   : > { %s1521_s21 = smov 128   ;;  %s1522_s3 = smov 256  }
 0x2d1   : > { %s1523_s16 = smov 8  }
 0x2d2   : > { %1248 = dma.vmem_to_hbm [thread:$0]  (%p2074_p0), %s1999_s1, 3584, %s1997_s29, %s1016_s28, %s1521_s21, %s1522_s3, %s1523_s16  }
 0x2d3 PF: > { %s1043_s17 = sand.u32 1, %s1496_s24   ;;  %p2075_p4 = scmp.ne.s32.totalorder %s2062_s14, 0 }
 0x2d4   : > { %p2076_p2 = scmp.ge.s32.totalorder %s1508_s27, 2  ;;  %s1044_s11 = scalar_lea.sflag [#allocation4], %s1043_s17 }
 0x2d6   : > { %p1265_p8 = pnand %p2076_p2, %p2075_p4 }
 0x2d8   : > { %p1266_p9 = pneg %p1265_p8 }
 0x2da   : > { %1491 = dma.done.wait (%p1266_p9), %s1044_s11, 3584  }
 0x2db   : > { %1493 = vsyncadd (%p1266_p9), %s1044_s11, 4294963712  ;;  %s2077_s19 = sld [smem:[#allocation15_spill]]  ;;  %p22_p3 = scmp.ge.s32.totalorder %s1589_s30, 4  }
 0x2dc   : > { %s2078_s24 = smov %s1500_s25  ;;  %s2079_s25 = smov %s1504_s26 }
 0x2dd   : > { %s2081_s27 = smov %s1589_s30  ;;  %24 = sbr.rel (!%p22_p3) target bundleno = 10 (0xa), region = 106 }
 0x2e1   : > { %s2080_s26 = smov %s2077_s19 }
 0x2e2   :  { %1049 = vsyncpa [#allocation3], 1 }
 0x2e3   :  { %1051 = vsyncpa [#allocation3 + $0x1], 1 }
 0x2e4   :  { %1052 = vsyncpa [#allocation6], 1 }
 0x2e5   :  { %1053 = vsyncpa [#allocation9], 1 }
 0x2e6   :  { %1055 = vsyncpa [#allocation9 + $0x1], 1 }
 0x2e7   :  { %1056 = vsyncpa [#allocation4], 1 }
 0x2e8   :  { %1058 = vsyncpa [#allocation4 + $0x1], 1 }

</bundles_post_ra>
